<compile_context>
chip_gen: v5e
topology: v5e:2x2
jax: 0.10.0
libtpu: 0.0.40
codegen_flags: <defaults>
</compile_context>

<pallas_src>
import jax
import jax.numpy as jnp
from jax.experimental import pallas as pl
from jax.experimental.pallas import tpu as pltpu

LANE = 128
NEG_BIG = -1e30  # finite "-inf" for padded class lanes (exp underflows to 0)


def _model_kernel(sg_ref, s0_ref, adj_nor_ref, adj_com_ref,
                  w0_ref, b0_ref, wc_ref, bc_ref, out_ref):
    # s0_ref block is (1, N, FEAT); squeeze the batch axis.
    x = s0_ref[0]

    # preprocess0: Linear (last=True => no ReLU); eval mode => no dropout.
    h = jnp.dot(x, w0_ref[...], preferred_element_type=jnp.float32) + b0_ref[...]
    # Gated sum accumulated incrementally; gate sigmoids are SMEM scalars.
    res = sg_ref[0] * h

    # Graph ops for arch = (1, 2, 1): adj_nor, adj_com, adj_nor.
    h = jnp.dot(adj_nor_ref[...], h, preferred_element_type=jnp.float32)
    res = res + sg_ref[1] * h
    h = jnp.dot(adj_com_ref[...], h, preferred_element_type=jnp.float32)
    res = res + sg_ref[2] * h
    h = jnp.dot(adj_nor_ref[...], h, preferred_element_type=jnp.float32)
    res = res + sg_ref[3] * h

    # classifier: Linear (last=True => no ReLU).  Padded class lanes carry a
    # -1e30 bias (weights there are zero), so they vanish from the softmax sum.
    logits = jnp.dot(res, wc_ref[...],
                     preferred_element_type=jnp.float32) + bc_ref[...]

    # log_softmax along the class axis (lane-dense: 128 lanes).
    m = jnp.max(logits, axis=-1, keepdims=True)
    lse = jnp.log(jnp.sum(jnp.exp(logits - m), axis=-1, keepdims=True)) + m
    out_ref[0] = logits - lse


def model_op_tchange_forward_batched(s0_b, adj_nor, adj_com, w0, b0, gate, wc, bc):
    """Batched forward: s0_b is (B, N, feat_dim); returns (B, N, num_classes)."""
    B, N, feat = s0_b.shape
    hid = w0.shape[1]
    num_classes = wc.shape[1]

    hpad = max(LANE, pl.cdiv(hid, LANE) * LANE)
    cpad = max(LANE, pl.cdiv(num_classes, LANE) * LANE)

    # Lane-dense padding (exact: padded hidden columns stay identically zero
    # through the whole chain; padded class columns get -1e30 logits).
    w0_p = jnp.pad(w0, ((0, 0), (0, hpad - hid)))
    b0_p = jnp.pad(b0.reshape(1, hid), ((0, 0), (0, hpad - hid)))
    wc_p = jnp.pad(wc, ((0, hpad - hid), (0, cpad - num_classes)))
    bc_p = jnp.pad(bc.reshape(1, num_classes),
                   ((0, 0), (0, cpad - num_classes)),
                   constant_values=NEG_BIG)

    # Gate sigmoids as 4 SMEM scalars (tiny; computed once outside the kernel).
    sg = jax.nn.sigmoid(gate.reshape(-1)).astype(jnp.float32)

    flops = int(2 * B * (N * feat * hpad + 3 * N * N * hpad + N * hpad * cpad))
    transcendentals = int(B * N * cpad + B * N)          # exp + log in log_softmax
    bytes_accessed = int(4 * (s0_b.size + 2 * N * N + w0_p.size + b0_p.size
                              + wc_p.size + bc_p.size + sg.size + B * N * cpad))

    out = pl.pallas_call(
        _model_kernel,
        out_shape=jax.ShapeDtypeStruct((B, N, cpad), jnp.float32),
        grid=(B,),
        in_specs=[
            pl.BlockSpec(memory_space=pltpu.MemorySpace.SMEM),      # sg (4,)
            pl.BlockSpec((1, N, feat), lambda b: (b, 0, 0)),        # s0 batch slice
            pl.BlockSpec((N, N), lambda b: (0, 0)),                 # adj_nor (shared)
            pl.BlockSpec((N, N), lambda b: (0, 0)),                 # adj_com (shared)
            pl.BlockSpec((feat, hpad), lambda b: (0, 0)),           # w0
            pl.BlockSpec((1, hpad), lambda b: (0, 0)),              # b0
            pl.BlockSpec((hpad, cpad), lambda b: (0, 0)),           # wc
            pl.BlockSpec((1, cpad), lambda b: (0, 0)),              # bc
        ],
        out_specs=pl.BlockSpec((1, N, cpad), lambda b: (b, 0, 0)),
        compiler_params=pltpu.CompilerParams(
            dimension_semantics=("parallel",)),
        cost_estimate=pl.CostEstimate(flops=flops,
                                      transcendentals=transcendentals,
                                      bytes_accessed=bytes_accessed),
    )(sg, s0_b, adj_nor, adj_com, w0_p, b0_p, wc_p, bc_p)

    return out[:, :, :num_classes]


def model_op_tchange_forward(s0, adj_nor, adj_com, w0, b0, gate, wc, bc):
    """Single-graph forward (the module's original signature)."""
    out = model_op_tchange_forward_batched(s0[None], adj_nor, adj_com,
                                           w0, b0, gate, wc, bc)
    return out[0]


def reference_forward(s0, adj_nor, adj_com, w0, b0, gate, wc, bc):
    h0 = s0 @ w0 + b0
    h1 = adj_nor @ h0
    h2 = adj_com @ h1
    h3 = adj_nor @ h2
    sg = jax.nn.sigmoid(gate)[0]
    res = sg[0] * h0 + sg[1] * h1 + sg[2] * h2 + sg[3] * h3
    logits = res @ wc + bc
    return jax.nn.log_softmax(logits, axis=1)


if __name__ == "__main__":
    key = jax.random.PRNGKey(0)
    k = jax.random.split(key, 8)

    B = 4            # batch of feature matrices sharing the same graph
    N = 16           # number of graph nodes
    FEAT_DIM = 32    # input feature dim
    HID_DIM = 32     # hidden dim
    NUM_CLASSES = 8  # output classes
    NUM_P = 4        # _numP for arch = (1, 2, 1)

    # Node features (batched).
    s0_b = jax.random.normal(k[0], (B, N, FEAT_DIM), dtype=jnp.float32)

    # Adjacency matrices (row-normalized random graphs, deterministic).
    a = jax.random.uniform(k[1], (N, N), dtype=jnp.float32)
    adj_nor = a / jnp.sum(a, axis=1, keepdims=True)
    bmat = jax.random.uniform(k[2], (N, N), dtype=jnp.float32)
    adj_com = bmat / jnp.sum(bmat, axis=1, keepdims=True)

    # preprocess0: Linear(feat_dim -> hid_dim), weights stored as [in, out].
    w0 = jax.random.normal(k[3], (FEAT_DIM, HID_DIM), dtype=jnp.float32) * 0.1
    b0 = jax.random.normal(k[4], (1, HID_DIM), dtype=jnp.float32) * 0.1

    # gate parameter: 1e-5 * randn(_numP)
    gate = 1e-5 * jax.random.normal(k[5], (1, NUM_P), dtype=jnp.float32)

    # classifier: Linear(hid_dim -> num_classes)
    wc = jax.random.normal(k[6], (HID_DIM, NUM_CLASSES), dtype=jnp.float32) * 0.1
    bc = jax.random.normal(k[7], (1, NUM_CLASSES), dtype=jnp.float32) * 0.1

    # Batched kernel run.
    out_b = model_op_tchange_forward_batched(s0_b, adj_nor, adj_com,
                                             w0, b0, gate, wc, bc)
    out_b = jax.block_until_ready(out_b)

    ref_b = jax.vmap(lambda x: reference_forward(x, adj_nor, adj_com,
                                                 w0, b0, gate, wc, bc))(s0_b)
    assert out_b.shape == (B, N, NUM_CLASSES)
    assert jnp.allclose(out_b, ref_b, atol=1e-4, rtol=1e-4), "batched mismatch"

    # Single-graph path (original module signature).
    out_s = model_op_tchange_forward(s0_b[0], adj_nor, adj_com,
                                     w0, b0, gate, wc, bc)
    out_s = jax.block_until_ready(out_s)
    assert out_s.shape == (N, NUM_CLASSES)
    assert jnp.allclose(out_s, ref_b[0], atol=1e-4, rtol=1e-4), "single mismatch"

    print("KERNEL_OK")
</pallas_src>

<mosaic_0001>
module attributes {stable_mosaic.version = 11 : i64} {
  func.func @_model_kernel(%arg0: i32, %arg1: memref<4xf32, #tpu.memory_space<smem>>, %arg2: memref<1x16x32xf32, #tpu.memory_space<vmem>>, %arg3: memref<16x16xf32, #tpu.memory_space<vmem>>, %arg4: memref<16x16xf32, #tpu.memory_space<vmem>>, %arg5: memref<32x128xf32, #tpu.memory_space<vmem>>, %arg6: memref<1x128xf32, #tpu.memory_space<vmem>>, %arg7: memref<128x128xf32, #tpu.memory_space<vmem>>, %arg8: memref<1x128xf32, #tpu.memory_space<vmem>>, %arg9: memref<1x16x128xf32, #tpu.memory_space<vmem>>) attributes {dimension_semantics = [#tpu.dimension_semantics<parallel>], iteration_bounds = array<i64: 4>, scalar_prefetch = 0 : i64, scratch_operands = 0 : i64, tpu.core_type = #tpu.core_type<tc>, window_params = [{transform_indices = @transform_0, window_bounds = array<i64: 4>}, {transform_indices = @transform_1, window_bounds = array<i64: 1, 16, 32>}, {pipeline_mode = #tpu.pipeline_mode<synchronous>, transform_indices = @transform_2, window_bounds = array<i64: 16, 16>}, {pipeline_mode = #tpu.pipeline_mode<synchronous>, transform_indices = @transform_3, window_bounds = array<i64: 16, 16>}, {pipeline_mode = #tpu.pipeline_mode<synchronous>, transform_indices = @transform_4, window_bounds = array<i64: 32, 128>}, {pipeline_mode = #tpu.pipeline_mode<synchronous>, transform_indices = @transform_5, window_bounds = array<i64: 1, 128>}, {pipeline_mode = #tpu.pipeline_mode<synchronous>, transform_indices = @transform_6, window_bounds = array<i64: 128, 128>}, {pipeline_mode = #tpu.pipeline_mode<synchronous>, transform_indices = @transform_7, window_bounds = array<i64: 1, 128>}, {transform_indices = @transform_8, window_bounds = array<i64: 1, 16, 128>}]} {
    %c0 = arith.constant 0 : index
    %c0_0 = arith.constant 0 : index
    %c0_1 = arith.constant 0 : index
    %0 = vector.load %arg2[%c0, %c0_0, %c0_1] : memref<1x16x32xf32, #tpu.memory_space<vmem>>, vector<1x16x32xf32>
    %1 = vector.shape_cast %0 : vector<1x16x32xf32> to vector<16x32xf32>
    %c0_2 = arith.constant 0 : index
    %c0_3 = arith.constant 0 : index
    %2 = vector.load %arg5[%c0_2, %c0_3] : memref<32x128xf32, #tpu.memory_space<vmem>>, vector<32x128xf32>
    %cst = arith.constant dense<0.000000e+00> : vector<16x128xf32>
    %3 = tpu.matmul %1, %2, %cst {dimension_numbers = #tpu.dot_dimension_numbers<[1], [0], [0], [1], [0, 0, 1, 1], [], []>} : vector<16x32xf32>, vector<32x128xf32>, vector<16x128xf32> -> vector<16x128xf32>
    %c0_4 = arith.constant 0 : index
    %c0_5 = arith.constant 0 : index
    %4 = vector.load %arg6[%c0_4, %c0_5] : memref<1x128xf32, #tpu.memory_space<vmem>>, vector<1x128xf32>
    %5 = vector.broadcast %4 : vector<1x128xf32> to vector<16x128xf32>
    %6 = arith.addf %3, %5 : vector<16x128xf32>
    %c0_6 = arith.constant 0 : index
    %7 = memref.load %arg1[%c0_6] : memref<4xf32, #tpu.memory_space<smem>>
    %8 = vector.broadcast %7 : f32 to vector<16x128xf32>
    %9 = arith.mulf %8, %6 : vector<16x128xf32>
    %c0_7 = arith.constant 0 : index
    %c0_8 = arith.constant 0 : index
    %10 = vector.load %arg3[%c0_7, %c0_8] : memref<16x16xf32, #tpu.memory_space<vmem>>, vector<16x16xf32>
    %cst_9 = arith.constant dense<0.000000e+00> : vector<16x128xf32>
    %11 = tpu.matmul %10, %6, %cst_9 {dimension_numbers = #tpu.dot_dimension_numbers<[1], [0], [0], [1], [0, 0, 1, 1], [], []>} : vector<16x16xf32>, vector<16x128xf32>, vector<16x128xf32> -> vector<16x128xf32>
    %c1 = arith.constant 1 : index
    %12 = memref.load %arg1[%c1] : memref<4xf32, #tpu.memory_space<smem>>
    %13 = vector.broadcast %12 : f32 to vector<16x128xf32>
    %14 = arith.mulf %13, %11 : vector<16x128xf32>
    %15 = arith.addf %9, %14 : vector<16x128xf32>
    %c0_10 = arith.constant 0 : index
    %c0_11 = arith.constant 0 : index
    %16 = vector.load %arg4[%c0_10, %c0_11] : memref<16x16xf32, #tpu.memory_space<vmem>>, vector<16x16xf32>
    %cst_12 = arith.constant dense<0.000000e+00> : vector<16x128xf32>
    %17 = tpu.matmul %16, %11, %cst_12 {dimension_numbers = #tpu.dot_dimension_numbers<[1], [0], [0], [1], [0, 0, 1, 1], [], []>} : vector<16x16xf32>, vector<16x128xf32>, vector<16x128xf32> -> vector<16x128xf32>
    %c2 = arith.constant 2 : index
    %18 = memref.load %arg1[%c2] : memref<4xf32, #tpu.memory_space<smem>>
    %19 = vector.broadcast %18 : f32 to vector<16x128xf32>
    %20 = arith.mulf %19, %17 : vector<16x128xf32>
    %21 = arith.addf %15, %20 : vector<16x128xf32>
    %c0_13 = arith.constant 0 : index
    %c0_14 = arith.constant 0 : index
    %22 = vector.load %arg3[%c0_13, %c0_14] : memref<16x16xf32, #tpu.memory_space<vmem>>, vector<16x16xf32>
    %cst_15 = arith.constant dense<0.000000e+00> : vector<16x128xf32>
    %23 = tpu.matmul %22, %17, %cst_15 {dimension_numbers = #tpu.dot_dimension_numbers<[1], [0], [0], [1], [0, 0, 1, 1], [], []>} : vector<16x16xf32>, vector<16x128xf32>, vector<16x128xf32> -> vector<16x128xf32>
    %c3 = arith.constant 3 : index
    %24 = memref.load %arg1[%c3] : memref<4xf32, #tpu.memory_space<smem>>
    %25 = vector.broadcast %24 : f32 to vector<16x128xf32>
    %26 = arith.mulf %25, %23 : vector<16x128xf32>
    %27 = arith.addf %21, %26 : vector<16x128xf32>
    %c0_16 = arith.constant 0 : index
    %c0_17 = arith.constant 0 : index
    %28 = vector.load %arg7[%c0_16, %c0_17] : memref<128x128xf32, #tpu.memory_space<vmem>>, vector<128x128xf32>
    %cst_18 = arith.constant dense<0.000000e+00> : vector<16x128xf32>
    %29 = tpu.matmul %27, %28, %cst_18 {dimension_numbers = #tpu.dot_dimension_numbers<[1], [0], [0], [1], [0, 0, 1, 1], [], []>} : vector<16x128xf32>, vector<128x128xf32>, vector<16x128xf32> -> vector<16x128xf32>
    %c0_19 = arith.constant 0 : index
    %c0_20 = arith.constant 0 : index
    %30 = vector.load %arg8[%c0_19, %c0_20] : memref<1x128xf32, #tpu.memory_space<vmem>>, vector<1x128xf32>
    %31 = vector.broadcast %30 : vector<1x128xf32> to vector<16x128xf32>
    %32 = arith.addf %29, %31 : vector<16x128xf32>
    %cst_21 = arith.constant dense<0xFF800000> : vector<16xf32>
    %33 = vector.multi_reduction <maximumf>, %32, %cst_21 [1] : vector<16x128xf32> to vector<16xf32>
    %34 = vector.shape_cast %33 : vector<16xf32> to vector<16x1xf32>
    %35 = vector.broadcast %34 : vector<16x1xf32> to vector<16x128xf32>
    %36 = arith.subf %32, %35 : vector<16x128xf32>
    %37 = math.exp %36 : vector<16x128xf32>
    %cst_22 = arith.constant dense<0.000000e+00> : vector<16xf32>
    %38 = vector.multi_reduction <add>, %37, %cst_22 [1] : vector<16x128xf32> to vector<16xf32>
    %39 = vector.shape_cast %38 : vector<16xf32> to vector<16x1xf32>
    %40 = math.log %39 : vector<16x1xf32>
    %41 = arith.addf %40, %34 : vector<16x1xf32>
    %42 = vector.broadcast %41 : vector<16x1xf32> to vector<16x128xf32>
    %43 = arith.subf %32, %42 : vector<16x128xf32>
    %c0_23 = arith.constant 0 : index
    %c0_24 = arith.constant 0 : index
    %c0_25 = arith.constant 0 : index
    %44 = vector.load %arg9[%c0_23, %c0_24, %c0_25] : memref<1x16x128xf32, #tpu.memory_space<vmem>>, vector<1x16x128xf32>
    %45 = vector.shape_cast %44 : vector<1x16x128xf32> to vector<16x128xf32>
    %46 = vector.shape_cast %43 : vector<16x128xf32> to vector<1x16x128xf32>
    tpu.vector_store %arg9[%c0_23, %c0_24, %c0_25], %46 {strides = array<i32>} : memref<1x16x128xf32, #tpu.memory_space<vmem>>, vector<1x16x128xf32>,
    return
  }
  func.func @transform_0(%arg0: i32) -> i32 {
    %c0_i32 = arith.constant 0 : i32
    %c0_i32_0 = arith.constant 0 : i32
    return %c0_i32 : i32
  }
  func.func @transform_1(%arg0: i32) -> (i32, i32, i32) {
    %c0_i32 = arith.constant 0 : i32
    %c0_i32_0 = arith.constant 0 : i32
    %c0_i32_1 = arith.constant 0 : i32
    return %arg0, %c0_i32, %c0_i32_0 : i32, i32, i32
  }
  func.func @transform_2(%arg0: i32) -> (i32, i32) {
    %c0_i32 = arith.constant 0 : i32
    %c0_i32_0 = arith.constant 0 : i32
    %c0_i32_1 = arith.constant 0 : i32
    return %c0_i32, %c0_i32_0 : i32, i32
  }
  func.func @transform_3(%arg0: i32) -> (i32, i32) {
    %c0_i32 = arith.constant 0 : i32
    %c0_i32_0 = arith.constant 0 : i32
    %c0_i32_1 = arith.constant 0 : i32
    return %c0_i32, %c0_i32_0 : i32, i32
  }
  func.func @transform_4(%arg0: i32) -> (i32, i32) {
    %c0_i32 = arith.constant 0 : i32
    %c0_i32_0 = arith.constant 0 : i32
    %c0_i32_1 = arith.constant 0 : i32
    return %c0_i32, %c0_i32_0 : i32, i32
  }
  func.func @transform_5(%arg0: i32) -> (i32, i32) {
    %c0_i32 = arith.constant 0 : i32
    %c0_i32_0 = arith.constant 0 : i32
    %c0_i32_1 = arith.constant 0 : i32
    return %c0_i32, %c0_i32_0 : i32, i32
  }
  func.func @transform_6(%arg0: i32) -> (i32, i32) {
    %c0_i32 = arith.constant 0 : i32
    %c0_i32_0 = arith.constant 0 : i32
    %c0_i32_1 = arith.constant 0 : i32
    return %c0_i32, %c0_i32_0 : i32, i32
  }
  func.func @transform_7(%arg0: i32) -> (i32, i32) {
    %c0_i32 = arith.constant 0 : i32
    %c0_i32_0 = arith.constant 0 : i32
    %c0_i32_1 = arith.constant 0 : i32
    return %c0_i32, %c0_i32_0 : i32, i32
  }
  func.func @transform_8(%arg0: i32) -> (i32, i32, i32) {
    %c0_i32 = arith.constant 0 : i32
    %c0_i32_0 = arith.constant 0 : i32
    %c0_i32_1 = arith.constant 0 : i32
    return %arg0, %c0_i32, %c0_i32_0 : i32, i32, i32
  }
}

</mosaic_0001>

<bundles_post_ra>
// kernel: tpu_custom_call.1
= control target key start
LH: loop header
LB: loop body
LE: loop exit
PB: predicated region body
PF: predicated region fallthrough
CT: control target
= control target key end

     0   :  { %s1439_s0 = inlined_call_operand.hbm [shape: f32[4], index: 0, kind: input, shape index: {}]   ;;  %s1440_s1 = inlined_call_operand.hbm [shape: f32[4,16,32], index: 1, kind: input, shape index: {}]   ;;  %s1441_s2 = inlined_call_operand.hbm [shape: f32[16,16], index: 2, kind: input, shape index: {}]   ;;  %s1442_s3 = inlined_call_operand.hbm [shape: f32[16,16], index: 3, kind: input, shape index: {}]   ;;  %s1443_s4 = inlined_call_operand.hbm [shape: f32[32,128], index: 4, kind: input, shape index: {}]   ;;  %s1444_s5 = inlined_call_operand.vmem [shape: f32[1,128], index: 5, kind: input, shape index: {}]   ;;  %s1445_s6 = inlined_call_operand.hbm [shape: f32[128,128], index: 6, kind: input, shape index: {}]   ;;  %s1446_s7 = inlined_call_operand.vmem [shape: f32[1,128], index: 7, kind: input, shape index: {}]   ;;  %s1447_s8 = inlined_call_operand.hbm [shape: f32[4,16,128], index: 8, kind: output, shape index: {}]  }
   0x1   :  { %1450 = sst [smem:[#allocation19_spill]] %s1439_s0 }
   0x2   :  { %1451 = sst [smem:[#allocation20_spill]] %s1441_s2 }
   0x3   :  { %13 = vsyncpa [#allocation5], 0 }
   0x4   :  { %14 = vsyncpa [#allocation3], 0 }
   0x5   :  { %16 = vsyncpa [#allocation3 + $0x1], 0 }
   0x6   :  { %17 = vsyncpa [#allocation8], 0 }
   0x7   :  { %18 = vsyncpa [#allocation11], 0 }
   0x8   :  { %19 = vsyncpa [#allocation4], 0 }
   0x9   :  { %21 = vsyncpa [#allocation4 + $0x1], 0  ;;  %s1223_s27 = smov 0   ;;  %s1225_s28 = smov 0  }
   0xa   :  { %s1227_s29 = smov 0   ;;  %s1229_s30 = smov 0  }
   0xb LB: > { %s1452_s2 = sld [smem:[#allocation20_spill]]  ;;  %s1247_s12 = sadd.s32 4294967295, %s1167_s30   ;;  %s1167_s30 = sphi %s1229_s30, %s1465_s30   ;;  %s1163_s29 = sphi %s1227_s29, %s1464_s29   ;;  %s1159_s28 = sphi %s1225_s28, %s1463_s28   ;;  %s1155_s27 = sphi %s1223_s27, %s1462_s27  }
   0xc   : > { %p761_p0 = scmp.ge.s32.totalorder %s1167_s30, 1  ;;  %p69_p1 = scmp.eq.s32.totalorder %s1247_s12, 0 }
   0xd   : > { %p231_p2 = scmp.lt.s32.totalorder %s1167_s30, 5  ;;  %s1169_s14 = smov [#allocation7]  }
   0xe   : > { %s254_s15 = sshll.u32 %s1169_s14, 4  ;;  %s280_s18 = sshll.u32 %s1443_s4, 4  ;;  %s255_s15 = int_to_ptr.vmem [resolvable:$true] %s254_s15  ;;  %s281_s18 = int_to_ptr.hbm [resolvable:$true] %s280_s18 }
   0xf   : > { %p1252_p3 = pnand %p761_p0, %p231_p2  ;;  %s1455_s0 = sld [smem:[#allocation19_spill]] }
  0x10   : > { %s1170_s23 = smov [#allocation10]   ;;  %s1448_s25 = smov 128  }
  0x11   : > { %s252_s11 = sshll.u32 %s1452_s2, 4  ;;  %p837_p4 = pneg %p1252_p3  ;;  %s253_s11 = int_to_ptr.hbm [resolvable:$true] %s252_s11 }
  0x12   : > { %s282_s24 = sshll.u32 %s1170_s23, 4  ;;  %s1449_s26 = smov 8   ;;  %s283_s24 = int_to_ptr.vmem [resolvable:$true] %s282_s24 }
  0x13   : > { %p1263_p5 = pnand %p837_p4, %p69_p1  ;;  %s266_s14 = sshll.u32 %s1442_s3, 4  ;;  %s267_s14 = int_to_ptr.hbm [resolvable:$true] %s266_s14 }
  0x14   : > { %s1173_s16 = smov [#allocation2]   ;;  %s1175_s21 = smov [#allocation12]  }
  0x15   : > { %s243_s22 = sshll.u32 %s1455_s0, 4  ;;  %s760_s23 = sadd.s32 4294967294, %s1167_s30   ;;  %s244_s22 = int_to_ptr.hbm [resolvable:$true] %s243_s22 }
  0x16   : > { %843 = dma.hbm_to_vmem [thread:$0]  (!%p1263_p5), %s253_s11, 256, %s255_s15, [#allocation8], %s1448_s25, %s1448_s25, %s1449_s26  }
  0x17   : > { %849 = dma.hbm_to_vmem [thread:$0]  (!%p1263_p5), %s281_s18, 512, %s283_s24, [#allocation11], %s1448_s25, %s1448_s25, %s1449_s26  }
  0x18   : > { %840 = dma.hbm_to_smem (!%p1263_p5), %s244_s22, 16, %s1173_s16, [#allocation5]  }
  0x19   : > { %s1174_s11 = smov [#allocation9]   ;;  %s297_s18 = sshll.u32 %s1445_s6, 4  ;;  %s298_s18 = int_to_ptr.hbm [resolvable:$true] %s297_s18 }
  0x1a   : > { %s268_s15 = sshll.u32 %s1174_s11, 4  ;;  %s299_s22 = sshll.u32 %s1175_s21, 4  ;;  %s269_s15 = int_to_ptr.vmem [resolvable:$true] %s268_s15  ;;  %s300_s22 = int_to_ptr.vmem [resolvable:$true] %s299_s22 }
  0x1b   : > { %846 = dma.hbm_to_vmem [thread:$0]  (!%p1263_p5), %s267_s14, 256, %s269_s15, [#allocation8], %s1448_s25, %s1448_s25, %s1449_s26  }
  0x1c   : > { %852 = dma.hbm_to_vmem [thread:$0]  (!%p1263_p5), %s298_s18, 2048, %s300_s22, [#allocation11], %s1448_s25, %s1448_s25, %s1449_s26  }
  0x1d   : > { %s1300_s24 = sadd.s32 1, %s1167_s30   ;;  %s55_s9 = sadd.s32 1, %s1163_s29 }
  0x1e   : > { %s52_s10 = ssub.s32 %s1167_s30, %s1300_s24  ;;  %p62_p6 = scmp.ne.s32.totalorder %s1163_s29, %s1159_s28 }
  0x1f   : > { %p53_p7 = scmp.eq.s32.totalorder %s52_s10, 0  ;;  %p63_p8 = scmp.eq.s32.totalorder %s1167_s30, 0 }
  0x20   : > { %p68_p9 = scmp.ne.s32.totalorder %s1159_s28, %s1155_s27  ;;  %p218_p10 = scmp.eq.s32.totalorder %s1247_s12, 3 }
  0x21   : > { %s1312_s14 = scalar_select %p53_p7, %s1163_s29, %s55_s9  }
  0x22   : > { %p1316_p11 = por %p69_p1, %p68_p9  ;;  %p1320_p12 = por %p218_p10, %p62_p6 }
  0x23   : > { %p224_p13 = scmp.eq.s32.totalorder %s760_s23, 3  ;;  %p64_p0 = por %p63_p8, %p62_p6 }
  0x24   : > { %s316_s11 = sand.u32 1, %s1163_s29   ;;  %p866_p4 = scmp.lt.s32.totalorder %s1167_s30, 4 }
  0x25   : > { %p1325_p2 = por %p224_p13, %p68_p9  ;;  %s768_s17 = sshll.u32 %s316_s11, 4 }
  0x26   : > { %s795_s20 = sshll.u32 %s1167_s30, 4  ;;  %s320_s10 = scalar_lea.vmem [#allocation6], %s768_s17 }
  0x27   : > { %s325_s22 = scalar_lea.hbm %s1440_s1, %s795_s20  ;;  %s328_s25 = sshll.u32 %s320_s10, 4  ;;  %s329_s25 = int_to_ptr.vmem [resolvable:$true] %s328_s25 }
  0x28   : > { %s326_s9 = sshll.u32 %s325_s22, 4  ;;  %p1334_p5 = pnand %p866_p4, %p64_p0  ;;  %s327_s9 = int_to_ptr.hbm [resolvable:$true] %s326_s9 }
  0x29   : > { %s317_s26 = scalar_lea.sflag [#allocation3], %s316_s11  ;;  %s1059_s0 = sshra.s32 %s327_s9, 4  ;;  %s1060_s0 = int_to_ptr.hbm [resolvable:$true] %s1059_s0 }
  0x2a   : > { %s1061_s2 = scalar_lea.hbm %s1060_s0, 16  ;;  %p1063_p7 = pneg %p1334_p5 }
  0x2b   : > { %p1062_p6 = scmp.ne.s32.totalorder %s1060_s0, %s1061_s2  ;;  %s1066_s17 = scalar_lea.hbm %s1440_s1, 64 }
  0x2c   : > { %p1067_p10 = scmp.lt.s32.totalorder %s1060_s0, %s1440_s1  ;;  %p1068_p13 = scmp.lt.s32.totalorder %s1066_s17, %s1061_s2 }
  0x2d   : > { %p1064_p8 = pnand %p1063_p7, %p1062_p6 }
  0x2e   : > { %p1069_p0 = por %p1068_p13, %p1067_p10 }
  0x2f   : > { %p1065_p9 = pneg %p1064_p8 }
  0x31   : > { %p1070_p4 = pnand %p1069_p0, %p1065_p9 }
  0x33   : > { %1073 = shalt.err (!%p1070_p4)
}
  0x34   : > { %s1460_s11 = smov 8   ;;  %s1461_s10 = smov 128  }
  0x35   : > { %856 = dma.hbm_to_vmem [thread:$0]  (!%p1334_p5), %s327_s9, 256, %s329_s25, %s317_s26, %s1461_s10, %s1461_s10, %s1460_s11  }
  0x36   : > { %340 = sbr.rel (%p1252_p3) target bundleno = 1035 (0x40b), region = 52 }
  0x3b   : > { %1134 = dma.done.wait (%p69_p1), [#allocation5], 16  }
  0x3c   : > { %1136 = vsyncadd (%p69_p1), [#allocation5], 4294967280  ;;  %s1358_s0 = sand.u32 1, %s1159_s28  }
  0x3d   : > { %s773_s2 = sshll.u32 %s1358_s0, 4  ;;  %s348_s23 = scalar_lea.sflag [#allocation3], %s1358_s0 }
  0x3e   : > { %s351_s25 = scalar_lea.vmem [#allocation6], %s773_s2 }
  0x3f   : > { %1138 = dma.done.wait (%p1316_p11), %s348_s23, 256  }
  0x40   : > { %1140 = vsyncadd (%p1316_p11), %s348_s23, 4294967040 }
  0x41   : > { %1142 = dma.done.wait (%p69_p1), [#allocation8], 512  }
  0x42   : > { %1144 = vsyncadd (%p69_p1), [#allocation8], 4294966784 }
  0x43   : > { %1146 = dma.done.wait (%p69_p1), [#allocation11], 2560  }
  0x44   : > { %1148 = vsyncadd (%p69_p1), [#allocation11], 4294964736 }
  0x45   : > { %377 = sfence }
  0x46   : > { %v411_v0 = vld [vmem:[#allocation10 + $0x18] sm:$0xff]  ;;  %v410_v1 = vld [vmem:[#allocation10 + $0x10] sm:$0xff]  ;;  %v409_v2 = vld [vmem:[#allocation10 + $0x8] sm:$0xff]  ;;  %vm416_vm0 = vcmask 261120   ;;  %vm452_vm1 = vcmask 130048   ;;  %s1387_s19 = sld [smem:[#allocation2]] }
  0x47   : > { %435 = vmatpush.msra.mxu0 %v411_v0  ;;  %v408_v3 = vld [vmem:[#allocation10] sm:$0xff]  ;;  %v407_v5 = vld [vmem:[%s351_s25 + $0x8] sm:$0xff]  ;;  %s1389_s9 = sld [smem:[#allocation2 + $0x1]]  ;;  %v488_v20 = vld [vmem:[#allocation9] sm:$0xff]  ;;  %s405_s22 = scalar_lea.vmem [#allocation13], %s773_s2 }
  0x48   : > { %v406_v4 = vld [vmem:[%s351_s25] sm:$0xff]  ;;  %v1383_v12 = vld [vmem:[#allocation7 + $0x8] sm:$0xff]  ;;  %v489_v21 = vld [vmem:[#allocation9 + $0x8] sm:$0xff]  ;;  %s1395_s20 = sld [smem:[#allocation2 + $0x2]]  ;;  %s796_s11 = sshll.u32 %s1247_s12, 4 }
  0x49   : > { %436 = vmatpush.msra.mxu0 %v410_v1  ;;  %v914_v7 = vld [vmem:[%s1444_s5] ss:$0 sm:$0xff]  ;;  %v569_v22 = vld [vmem:[#allocation12 + $0x78] sm:$0xff]  ;;  %v568_v23 = vld [vmem:[#allocation12 + $0x70] sm:$0xff]  ;;  %s789_s18 = sld [smem:[#allocation2 + $0x3]]  ;;  %s633_s25 = scalar_lea.hbm %s1447_s8, %s796_s11 }
  0x4a   : > { %v1379_v11 = vld [vmem:[#allocation7] sm:$0xff]  ;;  %574 = vmatpush.msra.mxu1 %v569_v22  ;;  %797 = vmatpush.msra.mxu2 %v569_v22  ;;  %v567_v24 = vld [vmem:[#allocation12 + $0x68] sm:$0xff]  ;;  %v565_v26 = vld [vmem:[#allocation12 + $0x58] sm:$0xff]  ;;  %s634_s13 = sshll.u32 %s405_s22, 4  ;;  %s636_s26 = sshll.u32 %s633_s25, 4  ;;  %s635_s13 = int_to_ptr.vmem [resolvable:$true] %s634_s13  ;;  %s637_s26 = int_to_ptr.hbm [resolvable:$true] %s636_s26 }
  0x4b   : > { %437 = vmatpush.msra.mxu0 %v409_v2  ;;  %v566_v25 = vld [vmem:[#allocation12 + $0x60] sm:$0xff]  ;;  %v564_v27 = vld [vmem:[#allocation12 + $0x50] sm:$0xff]  ;;  %v563_v29 = vld [vmem:[#allocation12 + $0x48] sm:$0xff]  ;;  %s1103_s2 = sshra.s32 %s637_s26, 4  ;;  %s1104_s2 = int_to_ptr.hbm [resolvable:$true] %s1103_s2 }
  0x4c   : > { %v447_v13 = vstv %s1387_s19  ;;  %575 = vmatpush.msra.mxu1 %v568_v23  ;;  %798 = vmatpush.msra.mxu2 %v568_v23  ;;  %v562_v31 = vld [vmem:[#allocation12 + $0x40] sm:$0xff]  ;;  %v561_v33 = vld [vmem:[#allocation12 + $0x38] sm:$0xff]  ;;  %v560_v35 = vld [vmem:[#allocation12 + $0x30] sm:$0xff]  ;;  %s622_s19 = scalar_lea.sflag [#allocation4], %s1358_s0  ;;  %p1110_p5 = scmp.lt.s32.totalorder %s1104_s2, %s1447_s8 }
  0x4d   : > { %438 = vmatpush.msra.mxu0 %v408_v3  ;;  %v483_v14 = vstv %s1389_s9  ;;  %v559_v37 = vld [vmem:[#allocation12 + $0x28] sm:$0xff]  ;;  %v558_v40 = vld [vmem:[#allocation12 + $0x20] sm:$0xff]  ;;  %v557_v43 = vld [vmem:[#allocation12 + $0x18] sm:$0xff]  ;;  %s1105_s9 = scalar_lea.hbm %s1104_s2, 16 }
  0x4e   : > { %779 = vmatmul.msk.f32.vlgmr.msra.gmra.mxu0 %vm416_vm0, %v406_v4  ;;  %576 = vmatpush.msra.mxu1 %v567_v24  ;;  %v520_v28 = vstv %s1395_s20  ;;  %v556_v45 = vld [vmem:[#allocation12 + $0x10] sm:$0xff]  ;;  %v555_v46 = vld [vmem:[#allocation12 + $0x8] sm:$0xff]  ;;  %v554_v47 = vld [vmem:[#allocation12] sm:$0xff]  ;;  %p1106_p1 = scmp.ne.s32.totalorder %s1104_s2, %s1105_s9 }
  0x4f   : > { %799 = vmatpush.msra.mxu2 %v567_v24  ;;  %v549_v48 = vstv %s789_s18  ;;  %v915_v55 = vld [vmem:[%s1446_s7] ss:$0 sm:$0xff]  ;;  %s1109_s18 = scalar_lea.hbm %s1447_s8, 64 }
  0x50   : > { %577 = vmatpush.msra.mxu1 %v566_v25  ;;  %p1107_p3 = pnand %p1106_p1, %p1320_p12  ;;  %p1111_p6 = scmp.lt.s32.totalorder %s1109_s18, %s1105_s9 }
  0x51   : > { %800 = vmatpush.msra.mxu2 %v566_v25 }
  0x52   : > { %578 = vmatpush.msra.mxu1 %v565_v26  ;;  %p1108_p11 = pneg %p1107_p3  ;;  %p1112_p7 = por %p1111_p6, %p1110_p5 }
  0x53   : > { %801 = vmatpush.msra.mxu2 %v565_v26 }
  0x54   : > { %579 = vmatpush.msra.mxu1 %v564_v27  ;;  %p1113_p8 = pnand %p1112_p7, %p1108_p11 }
  0x55   : > { %802 = vmatpush.msra.mxu2 %v564_v27 }
  0x56   : > { %780 = vmatmul.msk.f32.gmra.mxu0 %vm416_vm0, %v407_v5  ;;  %580 = vmatpush.msra.mxu1 %v563_v29 }
  0x57   : > { %803 = vmatpush.msra.mxu2 %v563_v29 }
  0x58   : > { %581 = vmatpush.msra.mxu1 %v562_v31 }
  0x59   : > { %804 = vmatpush.msra.mxu2 %v562_v31 }
  0x5a   : > { %582 = vmatpush.msra.mxu1 %v561_v33 }
  0x5b   : > { %805 = vmatpush.msra.mxu2 %v561_v33 }
  0x5c   : > { %583 = vmatpush.msra.mxu1 %v560_v35 }
  0x5d   : > { %806 = vmatpush.msra.mxu2 %v560_v35 }
  0x5e   : > { %584 = vmatpush.msra.mxu1 %v559_v37 }
  0x5f   : > { %807 = vmatpush.msra.mxu2 %v559_v37 }
  0x60   : > { %585 = vmatpush.msra.mxu1 %v558_v40 }
  0x61   : > { %808 = vmatpush.msra.mxu2 %v558_v40 }
  0x62   : > { %586 = vmatpush.msra.mxu1 %v557_v43 }
  0x63   : > { %809 = vmatpush.msra.mxu2 %v557_v43 }
  0x64   : > { %587 = vmatpush.msra.mxu1 %v556_v45 }
  0x65   : > { %810 = vmatpush.msra.mxu2 %v556_v45 }
  0x66   : > { %588 = vmatpush.msra.mxu1 %v555_v46 }
  0x67   : > { %811 = vmatpush.msra.mxu2 %v555_v46 }
  0x68   : > { %589 = vmatpush.msra.mxu1 %v554_v47 }
  0x69   : > { %812 = vmatpush.msra.mxu2 %v554_v47 }
  0xcb   : > { %v440_v6 = vpop.f32.mrf.mxu0 }
  0xcc   : > { %v441_v10 = vadd.f32 %v914_v7, %v440_v6 }
  0xce   : > { %v448_v16 = vmul.f32 %v447_v13, %v441_v10 }
  0xd3   : > { %v443_v8 = vpop.f32.mrf.mxu0 }
  0xd4   : > { %v444_v9 = vadd.f32 %v914_v7, %v443_v8 }
  0xd6   : > { %473 = vmatpush.msra.mxu3 %v444_v9  ;;  %v449_v38 = vmul.f32 %v447_v13, %v444_v9 }
  0xd8   : > { %474 = vmatpush.msra.mxu3 %v441_v10 }
  0xd9   : > { %781 = vmatmul.msk.f32.vlgmr.msra.gmra.mxu3 %vm452_vm1, %v1379_v11 }
  0xe1   : > { %782 = vmatmul.msk.f32.gmra.mxu3 %vm452_vm1, %v1383_v12 }
 0x15c   : > { %v476_v15 = vpop.f32.mrf.mxu3 }
 0x15d   : > { %v484_v17 = vmul.f32 %v483_v14, %v476_v15 }
 0x15f   : > { %v486_v18 = vadd.f32 %v484_v17, %v448_v16 }
 0x164   : > { %v479_v19 = vpop.f32.mrf.mxu3 }
 0x165   : > { %510 = vmatpush.msrb.mxu0 %v479_v19  ;;  %v485_v36 = vmul.f32 %v483_v14, %v479_v19 }
 0x167   : > { %511 = vmatpush.msrb.mxu0 %v476_v15  ;;  %v487_v41 = vadd.f32 %v485_v36, %v449_v38 }
 0x168   : > { %784 = vmatmul.msk.f32.vlgmr.msrb.gmra.mxu0 %vm452_vm1, %v488_v20 }
 0x170   : > { %785 = vmatmul.msk.f32.gmra.mxu0 %vm452_vm1, %v489_v21 }
 0x1e5   : > { %v513_v30 = vpop.f32.mrf.mxu0 }
 0x1e6   : > { %v521_v32 = vmul.f32 %v520_v28, %v513_v30 }
 0x1e8   : > { %v523_v34 = vadd.f32 %v521_v32, %v486_v18 }
 0x1ed   : > { %v516_v39 = vpop.f32.mrf.mxu0 }
 0x1ee   : > { %v522_v42 = vmul.f32 %v520_v28, %v516_v39  ;;  %539 = vmatpush.msrb.mxu3 %v516_v39 }
 0x1f0   : > { %v524_v44 = vadd.f32 %v522_v42, %v487_v41  ;;  %540 = vmatpush.msrb.mxu3 %v513_v30 }
 0x1f1   : > { %787 = vmatmul.msk.f32.vlgmr.msrb.gmra.mxu3 %vm452_vm1, %v1379_v11 }
 0x1f9   : > { %788 = vmatmul.msk.f32.gmra.mxu3 %vm452_vm1, %v1383_v12 }
 0x274   : > { %v542_v49 = vpop.f32.mrf.mxu3 }
 0x275   : > { %v550_v50 = vmul.f32 %v549_v48, %v542_v49 }
 0x277   : > { %v552_v51 = vadd.f32 %v550_v50, %v523_v34 }
 0x279   : > { %590 = vmatmul.f32.vlgmr.msra.gmra.mxu1 %v552_v51 }
 0x27c   : > { %v545_v52 = vpop.f32.mrf.mxu3 }
 0x27d   : > { %v551_v53 = vmul.f32 %v549_v48, %v545_v52 }
 0x27f   : > { %v553_v54 = vadd.f32 %v551_v53, %v524_v44 }
 0x281   : > { %593 = vmatmul.f32.vlgmr.msra.gmra.mxu2 %v553_v54 }
 0x2f6   : > { %v591_v56 = vpop.f32.mrf.mxu1 }
 0x2f7   : > { %v592_v57 = vadd.f32 %v915_v55, %v591_v56 }
 0x2f9   : > { %597 = vmax.xlane.f32.xlu0 %v592_v57 }
 0x304   : > { %v594_v58 = vpop.f32.mrf.mxu2 }
 0x305   : > { %v595_v59 = vadd.f32 %v915_v55, %v594_v58 }
 0x307   : > { %599 = vmax.xlane.f32.xlu0 %v595_v59 }
 0x36c   : > { %v598_v60 = vpop.xlane.xlu0 %597 }
 0x36d   : > { %v601_v61 = vsub.f32 %v592_v57, %v598_v60 }
 0x36f   : > { %v603_v62 = vmul.f32 1.442695, %v601_v61 }
 0x371   : > { %916 = vpow2.f32 %v603_v62 }
 0x377   : > { %v917_v63 = vpop.eup %916 }
 0x378   : > { %607 = vadd.xlane.f32.xlu1 %v917_v63 }
 0x37a   : > { %v600_v0 = vpop.xlane.xlu0 %599 }
 0x37b   : > { %v602_v1 = vsub.f32 %v595_v59, %v600_v0 }
 0x37d   : > { %v605_v2 = vmul.f32 1.442695, %v602_v1 }
 0x37f   : > { %918 = vpow2.f32 %v605_v2 }
 0x385   : > { %v919_v3 = vpop.eup %918 }
 0x386   : > { %609 = vadd.xlane.f32.xlu1 %v919_v3 }
 0x3eb   : > { %v608_v4 = vpop.xlane.xlu1 %607 }
 0x3ec   : > { %920 = vlog2.f32 %v608_v4 }
 0x3f2   : > { %v921_v5 = vpop.eup %920 }
 0x3f3   : > { %v612_v6 = vmul.f32 0.6931472, %v921_v5 }
 0x3f5   : > { %v615_v7 = vadd.f32 %v612_v6, %v598_v60 }
 0x3f7   : > { %v617_v8 = vsub.f32 %v592_v57, %v615_v7 }
 0x3f9   : > { %619 = vst [vmem:[%s405_s22] sm:$0xff] %v617_v8  ;;  %v610_v9 = vpop.xlane.xlu1 %609 }
 0x3fa   : > { %922 = vlog2.f32 %v610_v9 }
 0x400   : > { %v923_v10 = vpop.eup %922 }
 0x401   : > { %v614_v11 = vmul.f32 0.6931472, %v923_v10 }
 0x403   : > { %v616_v12 = vadd.f32 %v614_v11, %v600_v0 }
 0x405   : > { %v618_v13 = vsub.f32 %v595_v59, %v616_v12 }
 0x407   : > { %620 = vst [vmem:[%s405_s22 + $0x8] sm:$0xff] %v618_v13 }
 0x408   : > { %1116 = shalt.err (!%p1113_p8)
}
 0x409   : > { %s1176_s0 = smov 128   ;;  %s1177_s22 = smov 8  }
 0x40a   : > { %835 = dma.vmem_to_hbm [thread:$0]  (%p1320_p12), %s635_s13, 256, %s637_s26, %s622_s19, %s1176_s0, %s1176_s0, %s1177_s22  }
 0x40b PF: > { %p872_p9 = scmp.ge.s32.totalorder %s1167_s30, 2  ;;  %s651_s11 = sand.u32 1, %s1155_s27  }
 0x40c   : > { %s652_s10 = scalar_lea.sflag [#allocation4], %s651_s11 }
 0x40d   : > { %p858_p10 = pnand %p872_p9, %p1325_p2 }
 0x40f   : > { %p859_p13 = pneg %p858_p10 }
 0x411   : > { %1150 = dma.done.wait (%p859_p13), %s652_s10, 256  }
 0x412   : > { %1152 = vsyncadd (%p859_p13), %s652_s10, 4294967040  ;;  %p24_p0 = scmp.ge.s32.totalorder %s1300_s24, 6   ;;  %s1462_s27 = smov %s1159_s28 }
 0x413   : > { %s1463_s28 = smov %s1163_s29  ;;  %s1464_s29 = smov %s1312_s14 }
 0x414   : > { %s1465_s30 = smov %s1300_s24  ;;  %26 = sbr.rel (!%p24_p0) target bundleno = 11 (0xb), region = 118 }
 0x419   :  { %658 = vsyncpa [#allocation3], 1 }
 0x41a   :  { %660 = vsyncpa [#allocation3 + $0x1], 1 }
 0x41b   :  { %661 = vsyncpa [#allocation8], 1 }
 0x41c   :  { %662 = vsyncpa [#allocation11], 1 }
 0x41d   :  { %663 = vsyncpa [#allocation4], 1 }
 0x41e   :  { %665 = vsyncpa [#allocation4 + $0x1], 1 }
 0x41f   :  { %666 = vsyncpa [#allocation5], 1 }
 0x420   :  { %668 = vsyncpa [#allocation5 + $0x1], 1 }

</bundles_post_ra>
